<compile_context>
chip_gen: v5e
topology: v5e:2x2
jax: 0.10.0
libtpu: 0.0.40
codegen_flags: <defaults>
</compile_context>

<pallas_src>
import functools

import jax
import jax.numpy as jnp
from jax import lax
from jax.experimental import pallas as pl
from jax.experimental.pallas import tpu as pltpu


def siglip_attention_kernel(xq_ref, xkv_ref, wq_ref, bq_ref, wkv_ref, bkv_ref,
                            wo_ref, bo_ref, o_ref, ctx_ref,
                            *, num_heads, head_dim, scale):
    """One (batch, query-block) pair per grid step.

    xq_ref:  (1, TQ, D) bf16  — query rows for this tile
    xkv_ref: (1, N,  D) bf16  — full sequence (keys/values)
    o_ref:   (1, TQ, D) f32
    ctx_ref: (TQ, D)   f32 VMEM scratch (per-head context slab)
    """
    D = num_heads * head_dim

    xq = xq_ref[0]    # (TQ, D) bf16
    xkv = xkv_ref[0]  # (N, D)  bf16

    # Q projection, scale folded in (bf16 inputs, f32 accumulation).
    q = jnp.dot(xq, wq_ref[...], preferred_element_type=jnp.float32)
    q = ((q + bq_ref[...]) * scale).astype(jnp.bfloat16)          # (TQ, D)

    # Fused K/V projection: one MXU matmul of output width 2D.
    kv = jnp.dot(xkv, wkv_ref[...], preferred_element_type=jnp.float32)
    kv = (kv + bkv_ref[...]).astype(jnp.bfloat16)                 # (N, 2D)
    k = kv[:, :D]                                                 # (N, D)
    v = kv[:, D:]                                                 # (N, D)

    # Per-head scaled dot-product attention (num_heads is small & static).
    for h in range(num_heads):
        lo = h * head_dim
        qh = q[:, lo:lo + head_dim]          # (TQ, hd) bf16
        kh = k[:, lo:lo + head_dim]          # (N, hd)  bf16
        vh = v[:, lo:lo + head_dim]          # (N, hd)  bf16

        # QK^T without an explicit transpose: contract head_dim on both sides.
        s = lax.dot_general(qh, kh, (((1,), (1,)), ((), ())),
                            preferred_element_type=jnp.float32)   # (TQ, N)
        s = s - jnp.max(s, axis=-1, keepdims=True)
        p = jnp.exp(s)
        inv = pl.reciprocal(jnp.sum(p, axis=-1, keepdims=True), approx=True)
        p = p * inv                                               # softmax
        # dropout(p, p=0.0) is identity.

        ctx_ref[:, lo:lo + head_dim] = jnp.dot(
            p.astype(jnp.bfloat16), vh, preferred_element_type=jnp.float32)

    # Output projection from the assembled (TQ, D) context slab.
    ctx = ctx_ref[...].astype(jnp.bfloat16)
    out = jnp.dot(ctx, wo_ref[...], preferred_element_type=jnp.float32)
    out = out + bo_ref[...]
    o_ref[0] = out.astype(o_ref.dtype)


def _pick_query_tile(N, target=256):
    """Largest multiple-of-8 divisor of N that is <= target (or N itself)."""
    if N <= target:
        return N
    for tq in range(target, 7, -8):
        if N % tq == 0:
            return tq
    return N


def siglip_attention(hidden_states, params, *, num_heads, q_block=256):
    """hidden_states: (B, N, D) float32. params: dict of f32 weights/biases."""
    B, N, D = hidden_states.shape
    head_dim = D // num_heads
    scale = head_dim ** (-0.5)

    tq = _pick_query_tile(N, q_block)
    nq = N // tq

    # bf16 MXU inputs (f32 accumulation happens inside the kernel); biases stay
    # f32 since they are added to the f32 accumulators.
    x_bf16 = hidden_states.astype(jnp.bfloat16)
    wq = params["wq"].astype(jnp.bfloat16)
    bq = params["bq"]
    wkv = jnp.concatenate([params["wk"], params["wv"]], axis=-1).astype(jnp.bfloat16)
    bkv = jnp.concatenate([params["bk"], params["bv"]], axis=-1)
    wo = params["wo"].astype(jnp.bfloat16)
    bo = params["bo"]

    kernel = functools.partial(
        siglip_attention_kernel,
        num_heads=num_heads, head_dim=head_dim, scale=scale)

    const = lambda b, qi: (0, 0)

    # Advisory cost estimate for XLA's scheduler.
    flops = 8 * B * N * D * D + 4 * B * N * N * D
    transcendentals = B * num_heads * N * N
    bytes_accessed = (2 * B * N * D * 2            # x read twice (bf16)
                      + (3 * D * D + D * D) * 2    # bf16 weights
                      + 4 * D * 4                  # f32 biases
                      + B * N * D * 4)             # f32 output

    return pl.pallas_call(
        kernel,
        out_shape=jax.ShapeDtypeStruct((B, N, D), hidden_states.dtype),
        grid_spec=pltpu.PrefetchScalarGridSpec(
            num_scalar_prefetch=0,
            grid=(B, nq),
            in_specs=[
                pl.BlockSpec((1, tq, D), lambda b, qi: (b, qi, 0)),  # x (queries)
                pl.BlockSpec((1, N, D), lambda b, qi: (b, 0, 0)),    # x (keys/vals)
                pl.BlockSpec((D, D), const),                         # wq
                pl.BlockSpec((1, D), const),                         # bq
                pl.BlockSpec((D, 2 * D), const),                     # wkv (fused)
                pl.BlockSpec((1, 2 * D), const),                     # bkv (fused)
                pl.BlockSpec((D, D), const),                         # wo
                pl.BlockSpec((1, D), const),                         # bo
            ],
            out_specs=pl.BlockSpec((1, tq, D), lambda b, qi: (b, qi, 0)),
            scratch_shapes=[pltpu.VMEM((tq, D), jnp.float32)],
        ),
        compiler_params=pltpu.CompilerParams(
            dimension_semantics=("parallel", "parallel")),
        cost_estimate=pl.CostEstimate(
            flops=int(flops),
            transcendentals=int(transcendentals),
            bytes_accessed=int(bytes_accessed)),
    )(x_bf16, x_bf16, wq, bq, wkv, bkv, wo, bo)


def siglip_attention_reference(hidden_states, params, *, num_heads):
    """Pure-JAX f32 reference mirroring the PyTorch forward (intended semantics)."""
    B, N, D = hidden_states.shape
    hd = D // num_heads
    scale = hd ** (-0.5)

    def lin(x, w, b):
        return x @ w + b[0]

    q = lin(hidden_states, params["wq"], params["bq"])
    k = lin(hidden_states, params["wk"], params["bk"])
    v = lin(hidden_states, params["wv"], params["bv"])

    def split(t):  # (B, N, D) -> (B, H, N, hd)
        return t.reshape(B, N, num_heads, hd).transpose(0, 2, 1, 3)

    q, k, v = split(q), split(k), split(v)
    s = jnp.einsum("bhqd,bhkd->bhqk", q, k) * scale
    p = jax.nn.softmax(s, axis=-1)
    o = jnp.einsum("bhqk,bhkd->bhqd", p, v)
    o = o.transpose(0, 2, 1, 3).reshape(B, N, D)
    return lin(o, params["wo"], params["bo"])


def make_params(key, embed_dim):
    """Deterministic synthetic weights (shapes from SiglipAttention.__init__)."""
    ks = jax.random.split(key, 8)
    std = 1.0 / jnp.sqrt(embed_dim)

    def w(k):
        return jax.random.normal(k, (embed_dim, embed_dim), jnp.float32) * std

    def b(k):
        return jax.random.normal(k, (1, embed_dim), jnp.float32) * 0.01

    return {
        "wq": w(ks[0]), "bq": b(ks[1]),
        "wk": w(ks[2]), "bk": b(ks[3]),
        "wv": w(ks[4]), "bv": b(ks[5]),
        "wo": w(ks[6]), "bo": b(ks[7]),
    }


if __name__ == "__main__":
    # Small config: hidden_size=32, num_attention_heads=4, num_patches=8, batch=2.
    B, N, D, H = 2, 8, 32, 4

    key = jax.random.PRNGKey(0)
    k_x, k_p = jax.random.split(key)
    hidden_states = jax.random.normal(k_x, (B, N, D), jnp.float32)
    params = make_params(k_p, D)

    out = siglip_attention(hidden_states, params, num_heads=H)
    out = jax.block_until_ready(out)

    ref = siglip_attention_reference(hidden_states, params, num_heads=H)
    assert out.shape == (B, N, D)
    # bf16 MXU inputs + approx reciprocal loosen the tolerance slightly vs f32.
    assert jnp.allclose(out, ref, atol=5e-2, rtol=5e-2), "mismatch vs reference"

    print("KERNEL_OK")
</pallas_src>

<mosaic_0001>
module attributes {stable_mosaic.version = 11 : i64} {
  func.func @siglip_attention_kernel(%arg0: i32, %arg1: i32, %arg2: memref<1x8x32xbf16, #tpu.memory_space<vmem>>, %arg3: memref<1x8x32xbf16, #tpu.memory_space<vmem>>, %arg4: memref<32x32xbf16, #tpu.memory_space<vmem>>, %arg5: memref<1x32xf32, #tpu.memory_space<vmem>>, %arg6: memref<32x64xbf16, #tpu.memory_space<vmem>>, %arg7: memref<1x64xf32, #tpu.memory_space<vmem>>, %arg8: memref<32x32xbf16, #tpu.memory_space<vmem>>, %arg9: memref<1x32xf32, #tpu.memory_space<vmem>>, %arg10: memref<1x8x32xf32, #tpu.memory_space<vmem>>, %arg11: memref<8x32xf32, #tpu.memory_space<vmem>>) attributes {dimension_semantics = [#tpu.dimension_semantics<parallel>, #tpu.dimension_semantics<parallel>], iteration_bounds = array<i64: 2, 1>, scalar_prefetch = 0 : i64, scratch_operands = 1 : i64, tpu.core_type = #tpu.core_type<tc>, window_params = [{transform_indices = @transform_0, window_bounds = array<i64: 1, 8, 32>}, {transform_indices = @transform_1, window_bounds = array<i64: 1, 8, 32>}, {pipeline_mode = #tpu.pipeline_mode<synchronous>, transform_indices = @transform_2, window_bounds = array<i64: 32, 32>}, {pipeline_mode = #tpu.pipeline_mode<synchronous>, transform_indices = @transform_3, window_bounds = array<i64: 1, 32>}, {pipeline_mode = #tpu.pipeline_mode<synchronous>, transform_indices = @transform_4, window_bounds = array<i64: 32, 64>}, {pipeline_mode = #tpu.pipeline_mode<synchronous>, transform_indices = @transform_5, window_bounds = array<i64: 1, 64>}, {pipeline_mode = #tpu.pipeline_mode<synchronous>, transform_indices = @transform_6, window_bounds = array<i64: 32, 32>}, {pipeline_mode = #tpu.pipeline_mode<synchronous>, transform_indices = @transform_7, window_bounds = array<i64: 1, 32>}, {transform_indices = @transform_8, window_bounds = array<i64: 1, 8, 32>}]} {
    %c0 = arith.constant 0 : index
    %c0_0 = arith.constant 0 : index
    %c0_1 = arith.constant 0 : index
    %0 = vector.load %arg2[%c0, %c0_0, %c0_1] : memref<1x8x32xbf16, #tpu.memory_space<vmem>>, vector<1x8x32xbf16>
    %1 = vector.shape_cast %0 : vector<1x8x32xbf16> to vector<8x32xbf16>
    %c0_2 = arith.constant 0 : index
    %c0_3 = arith.constant 0 : index
    %c0_4 = arith.constant 0 : index
    %2 = vector.load %arg3[%c0_2, %c0_3, %c0_4] : memref<1x8x32xbf16, #tpu.memory_space<vmem>>, vector<1x8x32xbf16>
    %3 = vector.shape_cast %2 : vector<1x8x32xbf16> to vector<8x32xbf16>
    %c0_5 = arith.constant 0 : index
    %c0_6 = arith.constant 0 : index
    %4 = vector.load %arg4[%c0_5, %c0_6] : memref<32x32xbf16, #tpu.memory_space<vmem>>, vector<32x32xbf16>
    %cst = arith.constant dense<0.000000e+00> : vector<8x32xf32>
    %5 = tpu.matmul %1, %4, %cst {dimension_numbers = #tpu.dot_dimension_numbers<[1], [0], [0], [1], [0, 0, 1, 1], [], []>} : vector<8x32xbf16>, vector<32x32xbf16>, vector<8x32xf32> -> vector<8x32xf32>
    %c0_7 = arith.constant 0 : index
    %c0_8 = arith.constant 0 : index
    %6 = vector.load %arg5[%c0_7, %c0_8] : memref<1x32xf32, #tpu.memory_space<vmem>>, vector<1x32xf32>
    %7 = vector.broadcast %6 : vector<1x32xf32> to vector<8x32xf32>
    %8 = arith.addf %5, %7 : vector<8x32xf32>
    %cst_9 = arith.constant 0.353553385 : f32
    %9 = vector.broadcast %cst_9 : f32 to vector<8x32xf32>
    %10 = arith.mulf %8, %9 : vector<8x32xf32>
    %11 = arith.truncf %10 : vector<8x32xf32> to vector<8x32xbf16>
    %c0_10 = arith.constant 0 : index
    %c0_11 = arith.constant 0 : index
    %12 = vector.load %arg6[%c0_10, %c0_11] : memref<32x64xbf16, #tpu.memory_space<vmem>>, vector<32x64xbf16>
    %cst_12 = arith.constant dense<0.000000e+00> : vector<8x64xf32>
    %13 = tpu.matmul %3, %12, %cst_12 {dimension_numbers = #tpu.dot_dimension_numbers<[1], [0], [0], [1], [0, 0, 1, 1], [], []>} : vector<8x32xbf16>, vector<32x64xbf16>, vector<8x64xf32> -> vector<8x64xf32>
    %c0_13 = arith.constant 0 : index
    %c0_14 = arith.constant 0 : index
    %14 = vector.load %arg7[%c0_13, %c0_14] : memref<1x64xf32, #tpu.memory_space<vmem>>, vector<1x64xf32>
    %15 = vector.broadcast %14 : vector<1x64xf32> to vector<8x64xf32>
    %16 = arith.addf %13, %15 : vector<8x64xf32>
    %17 = arith.truncf %16 : vector<8x64xf32> to vector<8x64xbf16>
    %18 = vector.extract_strided_slice %17 {offsets = [0, 0], sizes = [8, 32], strides = [1, 1]} : vector<8x64xbf16> to vector<8x32xbf16>
    %19 = vector.extract_strided_slice %17 {offsets = [0, 32], sizes = [8, 32], strides = [1, 1]} : vector<8x64xbf16> to vector<8x32xbf16>
    %20 = vector.extract_strided_slice %11 {offsets = [0, 0], sizes = [8, 8], strides = [1, 1]} : vector<8x32xbf16> to vector<8x8xbf16>
    %21 = vector.extract_strided_slice %18 {offsets = [0, 0], sizes = [8, 8], strides = [1, 1]} : vector<8x32xbf16> to vector<8x8xbf16>
    %22 = vector.extract_strided_slice %19 {offsets = [0, 0], sizes = [8, 8], strides = [1, 1]} : vector<8x32xbf16> to vector<8x8xbf16>
    %cst_15 = arith.constant dense<0.000000e+00> : vector<8x8xf32>
    %23 = tpu.matmul %20, %21, %cst_15 {dimension_numbers = #tpu.dot_dimension_numbers<[1], [1], [0], [0], [0, 0, 1, 0], [], []>} : vector<8x8xbf16>, vector<8x8xbf16>, vector<8x8xf32> -> vector<8x8xf32>
    %cst_16 = arith.constant dense<0xFF800000> : vector<8xf32>
    %24 = vector.multi_reduction <maximumf>, %23, %cst_16 [1] : vector<8x8xf32> to vector<8xf32>
    %25 = vector.shape_cast %24 : vector<8xf32> to vector<8x1xf32>
    %26 = vector.broadcast %25 : vector<8x1xf32> to vector<8x8xf32>
    %27 = arith.subf %23, %26 : vector<8x8xf32>
    %28 = math.exp %27 : vector<8x8xf32>
    %cst_17 = arith.constant dense<0.000000e+00> : vector<8xf32>
    %29 = vector.multi_reduction <add>, %28, %cst_17 [1] : vector<8x8xf32> to vector<8xf32>
    %30 = vector.shape_cast %29 : vector<8xf32> to vector<8x1xf32>
    %31 = tpu.reciprocal %30 {approx = true} : vector<8x1xf32> -> vector<8x1xf32>
    %32 = vector.broadcast %31 : vector<8x1xf32> to vector<8x8xf32>
    %33 = arith.mulf %28, %32 : vector<8x8xf32>
    %34 = arith.truncf %33 : vector<8x8xf32> to vector<8x8xbf16>
    %cst_18 = arith.constant dense<0.000000e+00> : vector<8x8xf32>
    %35 = tpu.matmul %34, %22, %cst_18 {dimension_numbers = #tpu.dot_dimension_numbers<[1], [0], [0], [1], [0, 0, 1, 1], [], []>} : vector<8x8xbf16>, vector<8x8xbf16>, vector<8x8xf32> -> vector<8x8xf32>
    %c0_19 = arith.constant 0 : index
    %c0_20 = arith.constant 0 : index
    %36 = vector.load %arg11[%c0_19, %c0_20] : memref<8x32xf32, #tpu.memory_space<vmem>>, vector<8x8xf32>
    tpu.vector_store %arg11[%c0_19, %c0_20], %35 {strides = array<i32>} : memref<8x32xf32, #tpu.memory_space<vmem>>, vector<8x8xf32>,
    %37 = vector.extract_strided_slice %11 {offsets = [0, 8], sizes = [8, 8], strides = [1, 1]} : vector<8x32xbf16> to vector<8x8xbf16>
    %38 = vector.extract_strided_slice %18 {offsets = [0, 8], sizes = [8, 8], strides = [1, 1]} : vector<8x32xbf16> to vector<8x8xbf16>
    %39 = vector.extract_strided_slice %19 {offsets = [0, 8], sizes = [8, 8], strides = [1, 1]} : vector<8x32xbf16> to vector<8x8xbf16>
    %cst_21 = arith.constant dense<0.000000e+00> : vector<8x8xf32>
    %40 = tpu.matmul %37, %38, %cst_21 {dimension_numbers = #tpu.dot_dimension_numbers<[1], [1], [0], [0], [0, 0, 1, 0], [], []>} : vector<8x8xbf16>, vector<8x8xbf16>, vector<8x8xf32> -> vector<8x8xf32>
    %cst_22 = arith.constant dense<0xFF800000> : vector<8xf32>
    %41 = vector.multi_reduction <maximumf>, %40, %cst_22 [1] : vector<8x8xf32> to vector<8xf32>
    %42 = vector.shape_cast %41 : vector<8xf32> to vector<8x1xf32>
    %43 = vector.broadcast %42 : vector<8x1xf32> to vector<8x8xf32>
    %44 = arith.subf %40, %43 : vector<8x8xf32>
    %45 = math.exp %44 : vector<8x8xf32>
    %cst_23 = arith.constant dense<0.000000e+00> : vector<8xf32>
    %46 = vector.multi_reduction <add>, %45, %cst_23 [1] : vector<8x8xf32> to vector<8xf32>
    %47 = vector.shape_cast %46 : vector<8xf32> to vector<8x1xf32>
    %48 = tpu.reciprocal %47 {approx = true} : vector<8x1xf32> -> vector<8x1xf32>
    %49 = vector.broadcast %48 : vector<8x1xf32> to vector<8x8xf32>
    %50 = arith.mulf %45, %49 : vector<8x8xf32>
    %51 = arith.truncf %50 : vector<8x8xf32> to vector<8x8xbf16>
    %cst_24 = arith.constant dense<0.000000e+00> : vector<8x8xf32>
    %52 = tpu.matmul %51, %39, %cst_24 {dimension_numbers = #tpu.dot_dimension_numbers<[1], [0], [0], [1], [0, 0, 1, 1], [], []>} : vector<8x8xbf16>, vector<8x8xbf16>, vector<8x8xf32> -> vector<8x8xf32>
    %c0_25 = arith.constant 0 : index
    %c8 = arith.constant 8 : index
    %53 = vector.load %arg11[%c0_25, %c8] : memref<8x32xf32, #tpu.memory_space<vmem>>, vector<8x8xf32>
    tpu.vector_store %arg11[%c0_25, %c8], %52 {strides = array<i32>} : memref<8x32xf32, #tpu.memory_space<vmem>>, vector<8x8xf32>,
    %54 = vector.extract_strided_slice %11 {offsets = [0, 16], sizes = [8, 8], strides = [1, 1]} : vector<8x32xbf16> to vector<8x8xbf16>
    %55 = vector.extract_strided_slice %18 {offsets = [0, 16], sizes = [8, 8], strides = [1, 1]} : vector<8x32xbf16> to vector<8x8xbf16>
    %56 = vector.extract_strided_slice %19 {offsets = [0, 16], sizes = [8, 8], strides = [1, 1]} : vector<8x32xbf16> to vector<8x8xbf16>
    %cst_26 = arith.constant dense<0.000000e+00> : vector<8x8xf32>
    %57 = tpu.matmul %54, %55, %cst_26 {dimension_numbers = #tpu.dot_dimension_numbers<[1], [1], [0], [0], [0, 0, 1, 0], [], []>} : vector<8x8xbf16>, vector<8x8xbf16>, vector<8x8xf32> -> vector<8x8xf32>
    %cst_27 = arith.constant dense<0xFF800000> : vector<8xf32>
    %58 = vector.multi_reduction <maximumf>, %57, %cst_27 [1] : vector<8x8xf32> to vector<8xf32>
    %59 = vector.shape_cast %58 : vector<8xf32> to vector<8x1xf32>
    %60 = vector.broadcast %59 : vector<8x1xf32> to vector<8x8xf32>
    %61 = arith.subf %57, %60 : vector<8x8xf32>
    %62 = math.exp %61 : vector<8x8xf32>
    %cst_28 = arith.constant dense<0.000000e+00> : vector<8xf32>
    %63 = vector.multi_reduction <add>, %62, %cst_28 [1] : vector<8x8xf32> to vector<8xf32>
    %64 = vector.shape_cast %63 : vector<8xf32> to vector<8x1xf32>
    %65 = tpu.reciprocal %64 {approx = true} : vector<8x1xf32> -> vector<8x1xf32>
    %66 = vector.broadcast %65 : vector<8x1xf32> to vector<8x8xf32>
    %67 = arith.mulf %62, %66 : vector<8x8xf32>
    %68 = arith.truncf %67 : vector<8x8xf32> to vector<8x8xbf16>
    %cst_29 = arith.constant dense<0.000000e+00> : vector<8x8xf32>
    %69 = tpu.matmul %68, %56, %cst_29 {dimension_numbers = #tpu.dot_dimension_numbers<[1], [0], [0], [1], [0, 0, 1, 1], [], []>} : vector<8x8xbf16>, vector<8x8xbf16>, vector<8x8xf32> -> vector<8x8xf32>
    %c0_30 = arith.constant 0 : index
    %c16 = arith.constant 16 : index
    %70 = vector.load %arg11[%c0_30, %c16] : memref<8x32xf32, #tpu.memory_space<vmem>>, vector<8x8xf32>
    tpu.vector_store %arg11[%c0_30, %c16], %69 {strides = array<i32>} : memref<8x32xf32, #tpu.memory_space<vmem>>, vector<8x8xf32>,
    %71 = vector.extract_strided_slice %11 {offsets = [0, 24], sizes = [8, 8], strides = [1, 1]} : vector<8x32xbf16> to vector<8x8xbf16>
    %72 = vector.extract_strided_slice %18 {offsets = [0, 24], sizes = [8, 8], strides = [1, 1]} : vector<8x32xbf16> to vector<8x8xbf16>
    %73 = vector.extract_strided_slice %19 {offsets = [0, 24], sizes = [8, 8], strides = [1, 1]} : vector<8x32xbf16> to vector<8x8xbf16>
    %cst_31 = arith.constant dense<0.000000e+00> : vector<8x8xf32>
    %74 = tpu.matmul %71, %72, %cst_31 {dimension_numbers = #tpu.dot_dimension_numbers<[1], [1], [0], [0], [0, 0, 1, 0], [], []>} : vector<8x8xbf16>, vector<8x8xbf16>, vector<8x8xf32> -> vector<8x8xf32>
    %cst_32 = arith.constant dense<0xFF800000> : vector<8xf32>
    %75 = vector.multi_reduction <maximumf>, %74, %cst_32 [1] : vector<8x8xf32> to vector<8xf32>
    %76 = vector.shape_cast %75 : vector<8xf32> to vector<8x1xf32>
    %77 = vector.broadcast %76 : vector<8x1xf32> to vector<8x8xf32>
    %78 = arith.subf %74, %77 : vector<8x8xf32>
    %79 = math.exp %78 : vector<8x8xf32>
    %cst_33 = arith.constant dense<0.000000e+00> : vector<8xf32>
    %80 = vector.multi_reduction <add>, %79, %cst_33 [1] : vector<8x8xf32> to vector<8xf32>
    %81 = vector.shape_cast %80 : vector<8xf32> to vector<8x1xf32>
    %82 = tpu.reciprocal %81 {approx = true} : vector<8x1xf32> -> vector<8x1xf32>
    %83 = vector.broadcast %82 : vector<8x1xf32> to vector<8x8xf32>
    %84 = arith.mulf %79, %83 : vector<8x8xf32>
    %85 = arith.truncf %84 : vector<8x8xf32> to vector<8x8xbf16>
    %cst_34 = arith.constant dense<0.000000e+00> : vector<8x8xf32>
    %86 = tpu.matmul %85, %73, %cst_34 {dimension_numbers = #tpu.dot_dimension_numbers<[1], [0], [0], [1], [0, 0, 1, 1], [], []>} : vector<8x8xbf16>, vector<8x8xbf16>, vector<8x8xf32> -> vector<8x8xf32>
    %c0_35 = arith.constant 0 : index
    %c24 = arith.constant 24 : index
    %87 = vector.load %arg11[%c0_35, %c24] : memref<8x32xf32, #tpu.memory_space<vmem>>, vector<8x8xf32>
    tpu.vector_store %arg11[%c0_35, %c24], %86 {strides = array<i32>} : memref<8x32xf32, #tpu.memory_space<vmem>>, vector<8x8xf32>,
    %c0_36 = arith.constant 0 : index
    %c0_37 = arith.constant 0 : index
    %88 = vector.load %arg11[%c0_36, %c0_37] : memref<8x32xf32, #tpu.memory_space<vmem>>, vector<8x32xf32>
    %89 = arith.truncf %88 : vector<8x32xf32> to vector<8x32xbf16>
    %c0_38 = arith.constant 0 : index
    %c0_39 = arith.constant 0 : index
    %90 = vector.load %arg8[%c0_38, %c0_39] : memref<32x32xbf16, #tpu.memory_space<vmem>>, vector<32x32xbf16>
    %cst_40 = arith.constant dense<0.000000e+00> : vector<8x32xf32>
    %91 = tpu.matmul %89, %90, %cst_40 {dimension_numbers = #tpu.dot_dimension_numbers<[1], [0], [0], [1], [0, 0, 1, 1], [], []>} : vector<8x32xbf16>, vector<32x32xbf16>, vector<8x32xf32> -> vector<8x32xf32>
    %c0_41 = arith.constant 0 : index
    %c0_42 = arith.constant 0 : index
    %92 = vector.load %arg9[%c0_41, %c0_42] : memref<1x32xf32, #tpu.memory_space<vmem>>, vector<1x32xf32>
    %93 = vector.broadcast %92 : vector<1x32xf32> to vector<8x32xf32>
    %94 = arith.addf %91, %93 : vector<8x32xf32>
    %c0_43 = arith.constant 0 : index
    %c0_44 = arith.constant 0 : index
    %c0_45 = arith.constant 0 : index
    %95 = vector.load %arg10[%c0_43, %c0_44, %c0_45] : memref<1x8x32xf32, #tpu.memory_space<vmem>>, vector<1x8x32xf32>
    %96 = vector.shape_cast %95 : vector<1x8x32xf32> to vector<8x32xf32>
    %97 = vector.shape_cast %94 : vector<8x32xf32> to vector<1x8x32xf32>
    tpu.vector_store %arg10[%c0_43, %c0_44, %c0_45], %97 {strides = array<i32>} : memref<1x8x32xf32, #tpu.memory_space<vmem>>, vector<1x8x32xf32>,
    return
  }
  func.func @transform_0(%arg0: i32, %arg1: i32) -> (i32, i32, i32) {
    %c0_i32 = arith.constant 0 : i32
    %c0_i32_0 = arith.constant 0 : i32
    return %arg0, %arg1, %c0_i32 : i32, i32, i32
  }
  func.func @transform_1(%arg0: i32, %arg1: i32) -> (i32, i32, i32) {
    %c0_i32 = arith.constant 0 : i32
    %c0_i32_0 = arith.constant 0 : i32
    %c0_i32_1 = arith.constant 0 : i32
    return %arg0, %c0_i32, %c0_i32_0 : i32, i32, i32
  }
  func.func @transform_2(%arg0: i32, %arg1: i32) -> (i32, i32) {
    %c0_i32 = arith.constant 0 : i32
    %c0_i32_0 = arith.constant 0 : i32
    %c0_i32_1 = arith.constant 0 : i32
    return %c0_i32, %c0_i32_0 : i32, i32
  }
  func.func @transform_3(%arg0: i32, %arg1: i32) -> (i32, i32) {
    %c0_i32 = arith.constant 0 : i32
    %c0_i32_0 = arith.constant 0 : i32
    %c0_i32_1 = arith.constant 0 : i32
    return %c0_i32, %c0_i32_0 : i32, i32
  }
  func.func @transform_4(%arg0: i32, %arg1: i32) -> (i32, i32) {
    %c0_i32 = arith.constant 0 : i32
    %c0_i32_0 = arith.constant 0 : i32
    %c0_i32_1 = arith.constant 0 : i32
    return %c0_i32, %c0_i32_0 : i32, i32
  }
  func.func @transform_5(%arg0: i32, %arg1: i32) -> (i32, i32) {
    %c0_i32 = arith.constant 0 : i32
    %c0_i32_0 = arith.constant 0 : i32
    %c0_i32_1 = arith.constant 0 : i32
    return %c0_i32, %c0_i32_0 : i32, i32
  }
  func.func @transform_6(%arg0: i32, %arg1: i32) -> (i32, i32) {
    %c0_i32 = arith.constant 0 : i32
    %c0_i32_0 = arith.constant 0 : i32
    %c0_i32_1 = arith.constant 0 : i32
    return %c0_i32, %c0_i32_0 : i32, i32
  }
  func.func @transform_7(%arg0: i32, %arg1: i32) -> (i32, i32) {
    %c0_i32 = arith.constant 0 : i32
    %c0_i32_0 = arith.constant 0 : i32
    %c0_i32_1 = arith.constant 0 : i32
    return %c0_i32, %c0_i32_0 : i32, i32
  }
  func.func @transform_8(%arg0: i32, %arg1: i32) -> (i32, i32, i32) {
    %c0_i32 = arith.constant 0 : i32
    %c0_i32_0 = arith.constant 0 : i32
    return %arg0, %arg1, %c0_i32 : i32, i32, i32
  }
}

</mosaic_0001>

<bundles_post_ra>
// kernel: tpu_custom_call.1
= control target key start
LH: loop header
LB: loop body
LE: loop exit
PB: predicated region body
PF: predicated region fallthrough
CT: control target
= control target key end

     0   :  { %s1659_s0 = inlined_call_operand.hbm [shape: bf16[2,8,32], index: 0, kind: input, shape index: {}]   ;;  %s1660_s1 = inlined_call_operand.hbm [shape: bf16[2,8,32], index: 1, kind: input, shape index: {}]   ;;  %s1661_s2 = inlined_call_operand.hbm [shape: bf16[32,32], index: 2, kind: input, shape index: {}]   ;;  %s1662_s3 = inlined_call_operand.vmem [shape: f32[1,32], index: 3, kind: input, shape index: {}]   ;;  %s1663_s4 = inlined_call_operand.hbm [shape: bf16[32,64], index: 4, kind: input, shape index: {}]   ;;  %s1664_s5 = inlined_call_operand.vmem [shape: f32[1,64], index: 5, kind: input, shape index: {}]   ;;  %s1665_s6 = inlined_call_operand.hbm [shape: bf16[32,32], index: 6, kind: input, shape index: {}]   ;;  %s1666_s7 = inlined_call_operand.vmem [shape: f32[1,32], index: 7, kind: input, shape index: {}]   ;;  %s1667_s8 = inlined_call_operand.hbm [shape: f32[2,8,32], index: 8, kind: output, shape index: {}]  }
   0x1   :  { %1673 = sst [smem:[#allocation24_spill]] %s1661_s2 }
   0x2   :  { %1674 = sst [smem:[#allocation25_spill]] %s1663_s4 }
   0x3   :  { %1675 = sst [smem:[#allocation26_spill]] %s1665_s6 }
   0x4   :  { %13 = vsyncpa [#allocation4], 0 }
   0x5   :  { %15 = vsyncpa [#allocation4 + $0x1], 0 }
   0x6   :  { %16 = vsyncpa [#allocation7], 0 }
   0x7   :  { %18 = vsyncpa [#allocation7 + $0x1], 0 }
   0x8   :  { %19 = vsyncpa [#allocation10], 0 }
   0x9   :  { %20 = vsyncpa [#allocation5], 0 }
   0xa   :  { %22 = vsyncpa [#allocation5 + $0x1], 0  ;;  %s1439_s27 = smov 0   ;;  %s1441_s28 = smov 0  }
   0xb   :  { %s1443_s29 = smov 0   ;;  %s1445_s30 = smov 0  }
   0xc   :  { %s1447_s9 = smov 0   ;;  %s1449_s10 = smov 0  }
   0xd LB: > { %1676 = sst [smem:[#allocation18_spill]] %s1357_s27  ;;  %s1470_s11 = sadd.s32 4294967295, %s1377_s10   ;;  %s1377_s10 = sphi %s1449_s10, %s28_s10   ;;  %s1373_s9 = sphi %s1447_s9, %s1696_s9   ;;  %s1369_s30 = sphi %s1445_s30, %s1695_s30   ;;  %s1365_s29 = sphi %s1443_s29, %s1694_s29   ;;  %s1361_s28 = sphi %s1441_s28, %s1698_s28   ;;  %s1357_s27 = sphi %s1439_s27, %s1697_s27  }
   0xe   : > { %1677 = sst [smem:[#allocation19_spill]] %s1365_s29  ;;  %p943_p0 = scmp.ge.s32.totalorder %s1377_s10, 1 }
   0xf   : > { %1678 = sst [smem:[#allocation20_spill]] %s1373_s9  ;;  %p63_p1 = scmp.eq.s32.totalorder %s1470_s11, 0 }
  0x10   : > { %p253_p2 = scmp.lt.s32.totalorder %s1377_s10, 3  ;;  %s1679_s2 = sld [smem:[#allocation24_spill]] }
  0x11   : > { %s1379_s16 = smov [#allocation8]   ;;  %p947_p6 = scmp.ge.s32.totalorder %s1377_s10, 2 }
  0x12   : > { %p1478_p3 = pnand %p943_p0, %p253_p2  ;;  %s266_s17 = sshll.u32 %s1379_s16, 4  ;;  %s267_s17 = int_to_ptr.vmem [resolvable:$true] %s266_s17 }
  0x13   : > { %s1682_s4 = sld [smem:[#allocation25_spill]]  ;;  %s1380_s22 = smov 64  }
  0x14   : > { %p1022_p4 = pneg %p1478_p3  ;;  %s1381_s23 = smov 4  }
  0x15   : > { %s1382_s24 = smov [#allocation9]   ;;  %s1683_s6 = sld [smem:[#allocation26_spill]] }
  0x16   : > { %s264_s14 = sshll.u32 %s1679_s2, 4  ;;  %p1486_p5 = pnand %p1022_p4, %p63_p1  ;;  %s265_s14 = int_to_ptr.hbm [resolvable:$true] %s264_s14 }
  0x17   : > { %s283_s25 = sshll.u32 %s1382_s24, 4  ;;  %s1383_s16 = smov [#allocation11]   ;;  %s284_s25 = int_to_ptr.vmem [resolvable:$true] %s283_s25 }
  0x18   : > { %1025 = dma.hbm_to_vmem [thread:$0]  (!%p1486_p5), %s265_s14, 256, %s267_s17, [#allocation7], %s1380_s22, %s1380_s22, %s1381_s23  }
  0x19   : > { %s281_s21 = sshll.u32 %s1682_s4, 4  ;;  %s300_s19 = sshll.u32 %s1383_s16, 4  ;;  %s282_s21 = int_to_ptr.hbm [resolvable:$true] %s281_s21  ;;  %s301_s19 = int_to_ptr.vmem [resolvable:$true] %s300_s19 }
  0x1a   : > { %1028 = dma.hbm_to_vmem [thread:$0]  (!%p1486_p5), %s282_s21, 256, %s284_s25, [#allocation10], %s1380_s22, %s1380_s22, %s1381_s23  }
  0x1b   : > { %s298_s13 = sshll.u32 %s1683_s6, 4  ;;  %s942_s14 = sadd.s32 4294967294, %s1377_s10   ;;  %s299_s13 = int_to_ptr.hbm [resolvable:$true] %s298_s13 }
  0x1c   : > { %1031 = dma.hbm_to_vmem [thread:$0]  (!%p1486_p5), %s299_s13, 256, %s301_s19, [#allocation10], %s1380_s22, %s1380_s22, %s1381_s23  }
  0x1d   : > { %s40_s17 = sadd.s32 1, %s1373_s9  ;;  %s49_s20 = sadd.s32 1, %s1365_s29 }
  0x1e   : > { %p42_p7 = scmp.ge.s32.totalorder %s40_s17, 2  ;;  %p56_p8 = scmp.ne.s32.totalorder %s1365_s29, %s1361_s28 }
  0x1f   : > { %p57_p9 = scmp.eq.s32.totalorder %s1377_s10, 0  ;;  %p62_p10 = scmp.ne.s32.totalorder %s1361_s28, %s1357_s27 }
  0x20   : > { %s1700_s17 = smov (%p42_p7, %s40_s17), 0  ;;  %p240_p13 = scmp.eq.s32.totalorder %s1470_s11, 1 }
  0x21   : > { %1684 = sst [smem:[#allocation21_spill]] %s1700_s17  ;;  %p1513_p11 = por %p57_p9, %p56_p8 }
  0x22   : > { %p1519_p12 = por %p63_p1, %p62_p10  ;;  %s44_s22 = ssub.s32 %s1373_s9, %s1700_s17 }
  0x23   : > { %p47_p0 = scmp.eq.s32.totalorder %s44_s22, 0  ;;  %p246_p2 = scmp.eq.s32.totalorder %s942_s14, 1 }
  0x24   : > { %p1526_p4 = por %p240_p13, %p56_p8  ;;  %p1046_p5 = scmp.lt.s32.totalorder %s1377_s10, 2 }
  0x25   : > { %s1532_s24 = scalar_select %p47_p0, %s1365_s29, %s49_s20  }
  0x26   : > { %p1534_p7 = por %p246_p2, %p62_p10  ;;  %s317_s26 = sand.u32 1, %s1365_s29  }
  0x27   : > { %1688 = sst [smem:[#allocation22_spill]] %s1532_s24  ;;  %s948_s12 = sshll.u32 %s317_s26, 2 }
  0x28   : > { %s1689_s25 = scalar_select %p1534_p7, 1, 0 }
  0x29   : > { %s949_s13 = sshll.u32 %s1373_s9, 2  ;;  %s321_s14 = scalar_lea.vmem [#allocation3], %s948_s12 }
  0x2a   : > { %1690 = sst [smem:[#allocation23_spill]] %s1689_s25  ;;  %s326_s22 = scalar_lea.hbm %s1659_s0, %s949_s13 }
  0x2b   : > { %s330_s2 = sshll.u32 %s321_s14, 4  ;;  %s328_s4 = sshll.u32 %s326_s22, 4  ;;  %s331_s2 = int_to_ptr.vmem [resolvable:$true] %s330_s2  ;;  %s329_s4 = int_to_ptr.hbm [resolvable:$true] %s328_s4 }
  0x2c   : > { %p1033_p8 = pnand %p1046_p5, %p1513_p11  ;;  %s345_s17 = scalar_lea.hbm %s1660_s1, %s949_s13 }
  0x2d   : > { %s337_s24 = sand.u32 1, %s1377_s10   ;;  %s318_s25 = scalar_lea.sflag [#allocation4], %s317_s26 }
  0x2e   : > { %1035 = dma.hbm_to_vmem [thread:$0]  (!%p1033_p8), %s329_s4, 64, %s331_s2, %s318_s25  }
  0x2f   : > { %s347_s29 = sshll.u32 %s345_s17, 4  ;;  %s341_s9 = scalar_lea.vmem [#allocation6], %s948_s12  ;;  %s348_s29 = int_to_ptr.hbm [resolvable:$true] %s347_s29 }
  0x30   : > { %s349_s27 = sshll.u32 %s341_s9, 4  ;;  %s338_s16 = scalar_lea.sflag [#allocation7], %s337_s24  ;;  %s350_s27 = int_to_ptr.vmem [resolvable:$true] %s349_s27 }
  0x31   : > { %1038 = dma.hbm_to_vmem [thread:$0]  (!%p1033_p8), %s348_s29, 64, %s350_s27, %s338_s16  }
  0x32   : > { %358 = sbr.rel (%p1478_p3) target bundleno = 1395 (0x573), region = 52  ;;  %s1552_s21 = sand.u32 (!%p1478_p3), 1, %s1361_s28  }
  0x33   : > { %s953_s6 = sshll.u32 (!%p1478_p3), %s1552_s21, 2  ;;  %s361_s13 = scalar_lea.sflag (!%p1478_p3), [#allocation4], %s1552_s21 }
  0x34   : > { %s364_s26 = scalar_lea.vmem (!%p1478_p3), [#allocation3], %s953_s6 }
  0x37   : > { %1336 = dma.done.wait (%p1519_p12), %s361_s13, 64  }
  0x38   : > { %1338 = vsyncadd (%p1519_p12), %s361_s13, 4294967232  ;;  %s370_s2 = sand.u32 1, %s1470_s11   ;;  %s374_s27 = scalar_lea.vmem [#allocation6], %s953_s6 }
  0x39   : > { %s371_s4 = scalar_lea.sflag [#allocation7], %s370_s2 }
  0x3a   : > { %1340 = dma.done.wait (%p1519_p12), %s371_s4, 64  }
  0x3b   : > { %1342 = vsyncadd (%p1519_p12), %s371_s4, 4294967232 }
  0x3c   : > { %1344 = dma.done.wait (%p63_p1), [#allocation7], 256  }
  0x3d   : > { %1346 = vsyncadd (%p63_p1), [#allocation7], 4294967040 }
  0x3e   : > { %1348 = dma.done.wait (%p63_p1), [#allocation10], 512  }
  0x3f   : > { %1350 = vsyncadd (%p63_p1), [#allocation10], 4294966784  ;;  %v999_v0 = vld [vmem:[#allocation8 + $0x8] sm:$0xff]  ;;  %v1001_v1 = vld [vmem:[#allocation9 + $0x8] sm:$0xff]  ;;  %vm451_vm0 = vcmask 261120   ;;  %vm507_vm1 = vcmask 64512  }
  0x40   : > { %v998_v2 = vld [vmem:[#allocation8] sm:$0xff]  ;;  %461 = vmatpush.bf16.msra.mxu0 %v999_v0  ;;  %499 = vmatpush.bf16.msra.mxu1 %v1001_v1  ;;  %v1000_v3 = vld [vmem:[#allocation9] sm:$0xff]  ;;  %v430_v5 = vld [vmem:[%s374_s27] sm:$0xf]  ;;  %s1384_s17 = smov 96   ;;  %s1385_s18 = smov 120  }
  0x41   : > { %v429_v4 = vld [vmem:[%s364_s26] sm:$0xf]  ;;  %v1114_v6 = vld [vmem:[%s1662_s3] ss:$0 sm:$0xff]  ;;  %s1386_s24 = smov 112   ;;  %s1387_s25 = smov 104  }
  0x42   : > { %v1115_v7 = vld [vmem:[%s1664_s5] ss:$0 sm:$0xff]  ;;  %vm547_vm2 = vcmask 1043456   ;;  %s1388_s12 = smov 88   ;;  %s1389_s19 = smov 80   ;;  %vm628_vm3 = vcmask 130112  }
  0x43   : > { %s1390_s22 = smov 72   ;;  %s1391_s14 = smov 8   ;;  %vm690_vm4 = vcmask 195712   ;;  %vm752_vm5 = vcmask 261312  }
  0x44   : > { %462 = vmatpush.bf16.msra.mxu0 %v998_v2  ;;  %500 = vmatpush.bf16.msra.mxu1 %v1000_v3  ;;  %s1392_s20 = smov 16   ;;  %s1393_s16 = smov 24  }
  0x45   : > { %s995_s6 = sshll.u32 %s1369_s30, 3  ;;  %s958_s13 = sshll.u32 %s1552_s21, 3 }
  0x46   : > { %s805_s4 = scalar_lea.hbm %s1667_s8, %s995_s6  ;;  %s427_s9 = scalar_lea.vmem [#allocation12], %s958_s13 }
  0x47   : > { %967 = vmatmul.msk.bf16.vlgmr.msra.gmra.mxu0 %vm451_vm0, %v429_v4  ;;  %976 = vmatmul.msk.bf16.vlgmr.msra.gmra.mxu1 %vm451_vm0, %v430_v5  ;;  %s807_s11 = sshll.u32 %s427_s9, 4  ;;  %s809_s15 = sshll.u32 %s805_s4, 4  ;;  %s808_s11 = int_to_ptr.vmem [resolvable:$true] %s807_s11  ;;  %s810_s15 = int_to_ptr.hbm [resolvable:$true] %s809_s15 }
  0x48   : > { %s794_s30 = scalar_lea.sflag [#allocation5], %s1552_s21 }
  0xc4   : > { %v464_v8 = vpop.f32.mrf.mxu0  ;;  %v502_v9 = vpop.f32.mrf.mxu1 }
  0xc5   : > { %v465_v10 = vadd.f32 %v1114_v6, %v464_v8  ;;  %v503_v11 = vadd.f32 %v1115_v7, %v502_v9 }
  0xc7   : > { %v468_v12 = vmul.f32 0.35355338, %v465_v10  ;;  %v506_v13 = vpack.c.bf16 %v503_v11, %v503_v11 }
  0xc9   : > { %v469_v14 = vpack.c.bf16 %v468_v12, %v468_v12  ;;  %v540_v15 = vunpack.c.l.b16 %v506_v13  ;;  %v512_v16 = vsel %vm507_vm1, %v506_v13, 0 }
  0xca   : > { %521 = vmatpush.bf16.xpose.msra.mxu2 %v512_v16 }
  0xcb   : > { %v566_v17 = vunpack.c.l.b16 %v469_v14  ;;  %v1582_v18 = vpack.c.b16 %v540_v15, %v540_v15 }
  0xcc   : > { %v466_v19 = vpop.f32.mrf.mxu0  ;;  %v504_v20 = vpop.f32.mrf.mxu1 }
  0xcd   : > { %542 = vrot.lane.b32.xlu1 %v1582_v18, %s1384_s17  ;;  %v567_v21 = vpack.c.b16 %v566_v17, %v566_v17  ;;  %s1297_s17 = sshra.s32 %s810_s15, 4  ;;  %s1298_s17 = int_to_ptr.hbm [resolvable:$true] %s1297_s17 }
  0xce   : > { %p1304_p10 = scmp.lt.s32.totalorder %s1298_s17, %s1667_s8 }
  0xcf   : > { %568 = vrot.lane.b32.xlu2 %v567_v21, %s1385_s18 }
  0xd1   : > { %977 = vmatmul.msk.bf16.vlgmr.msra.gmra.mxu2 %vm507_vm1, %v469_v14 }
  0xd5   : > { %570 = vrot.lane.b32.xlu1 %v1582_v18, %s1385_s18  ;;  %s1299_s18 = scalar_lea.hbm %s1298_s17, 8 }
  0xd6   : > { %p1300_p1 = scmp.ne.s32.totalorder %s1298_s17, %s1299_s18 }
  0xd7   : > { %632 = vrot.lane.b32.xlu2 %v1582_v18, %s1386_s24 }
  0xd8   : > { %p1301_p3 = pnand %p1300_p1, %p1526_p4 }
  0xda   : > { %p1302_p9 = pneg %p1301_p3 }
  0xdd   : > { %630 = vrot.lane.b32.xlu1 %v567_v21, %s1386_s24 }
  0xdf   : > { %692 = vrot.lane.b32.xlu2 %v567_v21, %s1387_s25 }
 0x129   : > { %v569_v22 = vpop.permute.xlu2 %568 }
 0x131   : > { %v633_v23 = vpop.permute.xlu2 %632 }
 0x132   : > { %v638_v24 = vsel %vm507_vm1, %v633_v23, 0 }
 0x133   : > { %647 = vmatpush.bf16.xpose.msrb.mxu1 %v638_v24 }
 0x139   : > { %v693_v41 = vpop.permute.xlu2 %692 }
 0x13f   : > { %v543_v25 = vpop.permute.xlu1 %542 }
 0x140   : > { %v549_v26 = vsel %vm547_vm2, %v543_v25, 0 }
 0x141   : > { %558 = vmatpush.bf16.msra.mxu3 %v549_v26 }
 0x147   : > { %v571_v27 = vpop.permute.xlu1 %570 }
 0x148   : > { %v576_v28 = vsel %vm507_vm1, %v571_v27, 0 }
 0x149   : > { %585 = vmatpush.bf16.xpose.msrb.mxu3 %v576_v28 }
 0x14f   : > { %v631_v29 = vpop.permute.xlu1 %630 }
 0x150   : > { %981 = vmatmul.msk.bf16.vlgmr.msrb.gmra.mxu1 %vm507_vm1, %v631_v29 }
 0x154   : > { %v523_v30 = vpop.f32.mrf.mxu2 }
 0x155   : > { %v527_v31 = vsel %vm507_vm1, %v523_v30, -inf }
 0x156   : > { %528 = vmax.xlane.f32.xlu0 %v527_v31  ;;  %v1003_v31 = vld [vmem:[#allocation11 + $0x8] sm:$0xff] }
 0x157   : > { %785 = vmatpush.bf16.msra.mxu1 %v1003_v31 }
 0x15c   : > { %v525_v32 = vpop.f32.mrf.mxu2 }
 0x15d   : > { %v1002_v32 = vld [vmem:[#allocation11] sm:$0xff] }
 0x15e   : > { %786 = vmatpush.bf16.msra.mxu1 %v1002_v32 }
 0x1c9   : > { %v529_v33 = vpop.xlane.xlu0 %528 }
 0x1ca   : > { %v530_v34 = vsub.f32 %v523_v30, %v529_v33 }
 0x1cc   : > { %v531_v35 = vmul.f32 1.442695, %v530_v34 }
 0x1cd   : > { %v649_v36 = vpop.f32.mrf.mxu1 }
 0x1ce   : > { %1117 = vpow2.f32 %v531_v35  ;;  %v653_v37 = vsel %vm507_vm1, %v649_v36, -inf }
 0x1cf   : > { %654 = vmax.xlane.f32.xlu2 %v653_v37 }
 0x1d4   : > { %v1118_v38 = vpop.eup %1117 }
 0x1d5   : > { %v651_v39 = vpop.f32.mrf.mxu1  ;;  %v533_v40 = vsel %vm507_vm1, %v1118_v38, 0.0 }
 0x1d6   : > { %534 = vadd.xlane.f32.xlu0 %v533_v40 }
 0x1ea   : > { %694 = vrot.lane.b32.xlu0 %v1582_v18, %s1387_s25 }
 0x242   : > { %v655_v42 = vpop.xlane.xlu2 %654 }
 0x243   : > { %v656_v43 = vsub.f32 %v649_v36, %v655_v42 }
 0x245   : > { %v657_v44 = vmul.f32 1.442695, %v656_v43 }
 0x247   : > { %1119 = vpow2.f32 %v657_v44 }
 0x249   : > { %v535_v45 = vpop.xlane.xlu0 %534 }
 0x24a   : > { %1121 = vrcp.f32 %v535_v45 }
 0x24d   : > { %v1120_v46 = vpop.eup %1119 }
 0x24e   : > { %v659_v47 = vsel %vm507_vm1, %v1120_v46, 0.0 }
 0x24f   : > { %660 = vadd.xlane.f32.xlu2 %v659_v47 }
 0x250   : > { %v1122_v48 = vpop.eup %1121 }
 0x251   : > { %v537_v49 = vmul.f32 %v1122_v48, %v1118_v38  ;;  %v1116_v38 = vld [vmem:[%s1666_s7] ss:$0 sm:$0xff] }
 0x253   : > { %v538_v50 = vpack.c.bf16 %v537_v49, %v537_v49 }
 0x255   : > { %978 = vmatmul.msk.bf16.vlgmr.msra.gmra.mxu3 %vm507_vm1, %v538_v50 }
 0x25c   : > { %v695_v51 = vpop.permute.xlu0 %694 }
 0x25d   : > { %v700_v52 = vsel %vm507_vm1, %v695_v51, 0 }
 0x25e   : > { %709 = vmatpush.bf16.xpose.msra.mxu3 %v700_v52 }
 0x265   : > { %979 = vmatmul.msk.bf16.vlgmr.msrb.gmra.mxu3 %vm507_vm1, %v569_v22 }
 0x275   : > { %983 = vmatmul.msk.bf16.vlgmr.msra.gmra.mxu3 %vm507_vm1, %v693_v41 }
 0x2c2   : > { %v661_v9 = vpop.xlane.xlu2 %660 }
 0x2d8   : > { %v560_v53 = vpop.f32.mrf.mxu3 }
 0x2d9   : > { %564 = vst.msk [vmem:[#allocation2] sm:$0xff] %vm507_vm1, %v560_v53 }
 0x2e0   : > { %v562_v54 = vpop.f32.mrf.mxu3 }
 0x2e8   : > { %v587_v55 = vpop.f32.mrf.mxu3 }
 0x2e9   : > { %v591_v56 = vsel %vm507_vm1, %v587_v55, -inf }
 0x2ea   : > { %592 = vmax.xlane.f32.xlu1 %v591_v56 }
 0x2f0   : > { %v589_v57 = vpop.f32.mrf.mxu3 }
 0x2f8   : > { %v711_v58 = vpop.f32.mrf.mxu3 }
 0x2f9   : > { %v715_v59 = vsel %vm507_vm1, %v711_v58, -inf }
 0x2fa   : > { %716 = vmax.xlane.f32.xlu0 %v715_v59 }
 0x300   : > { %v713_v60 = vpop.f32.mrf.mxu3 }
 0x303   : > { %603 = vrot.lane.b32.xlu1 %v1582_v18, %s1388_s12  ;;  %s1303_s12 = scalar_lea.hbm %s1667_s8, 16 }
 0x304   : > { %p1305_p11 = scmp.lt.s32.totalorder %s1303_s12, %s1299_s18 }
 0x306   : > { %p1306_p12 = por %p1305_p11, %p1304_p10 }
 0x308   : > { %p1307_p13 = pnand %p1306_p12, %p1302_p9 }
 0x35d   : > { %v593_v61 = vpop.xlane.xlu1 %592 }
 0x35e   : > { %v594_v62 = vsub.f32 %v587_v55, %v593_v61 }
 0x360   : > { %v595_v63 = vmul.f32 1.442695, %v594_v62 }
 0x362   : > { %1123 = vpow2.f32 %v595_v63 }
 0x368   : > { %v1124_v0 = vpop.eup %1123 }
 0x369   : > { %v597_v1 = vsel %vm507_vm1, %v1124_v0, 0.0 }
 0x36a   : > { %598 = vadd.xlane.f32.xlu2 %v597_v1 }
 0x36d   : > { %v717_v2 = vpop.xlane.xlu0 %716 }
 0x36e   : > { %v718_v3 = vsub.f32 %v711_v58, %v717_v2 }
 0x370   : > { %v719_v4 = vmul.f32 1.442695, %v718_v3 }
 0x372   : > { %1125 = vpow2.f32 %v719_v4 }
 0x373   : > { %1127 = vrcp.f32 %v661_v9 }
 0x375   : > { %v604_v5 = vpop.permute.xlu1 %603 }
 0x376   : > { %v609_v6 = vsel %vm547_vm2, %v604_v5, 0 }
 0x377   : > { %618 = vmatpush.bf16.msrb.mxu0 %v609_v6 }
 0x378   : > { %v1126_v7 = vpop.eup %1125 }
 0x379   : > { %v721_v8 = vsel %vm507_vm1, %v1126_v7, 0.0  ;;  %v1128_v11 = vpop.eup %1127 }
 0x37a   : > { %722 = vadd.xlane.f32.xlu0 %v721_v8  ;;  %v663_v13 = vmul.f32 %v1128_v11, %v1120_v46 }
 0x37c   : > { %v664_v19 = vpack.c.bf16 %v663_v13, %v663_v13 }
 0x382   : > { %665 = vrot.lane.b32.xlu2 %v1582_v18, %s1389_s19 }
 0x38e   : > { %727 = vrot.lane.b32.xlu0 %v1582_v18, %s1390_s22 }
 0x3dd   : > { %v599_v10 = vpop.xlane.xlu2 %598 }
 0x3de   : > { %1129 = vrcp.f32 %v599_v10 }
 0x3e4   : > { %v1130_v12 = vpop.eup %1129 }
 0x3e5   : > { %v601_v14 = vmul.f32 %v1130_v12, %v1124_v0  ;;  %v666_v15 = vpop.permute.xlu2 %665 }
 0x3e6   : > { %v671_v16 = vsel %vm547_vm2, %v666_v15, 0 }
 0x3e7   : > { %680 = vmatpush.bf16.msrb.mxu2 %v671_v16  ;;  %v602_v17 = vpack.c.bf16 %v601_v14, %v601_v14 }
 0x3e9   : > { %980 = vmatmul.msk.bf16.vlgmr.msrb.gmra.mxu0 %vm507_vm1, %v602_v17 }
 0x3ea   : > { %982 = vmatmul.msk.bf16.vlgmr.msrb.gmra.mxu2 %vm507_vm1, %v664_v19 }
 0x3ed   : > { %v723_v20 = vpop.xlane.xlu0 %722 }
 0x3ee   : > { %1131 = vrcp.f32 %v723_v20 }
 0x3f4   : > { %v1132_v18 = vpop.eup %1131 }
 0x3f5   : > { %v725_v21 = vmul.f32 %v1132_v18, %v1126_v7 }
 0x3f7   : > { %v726_v24 = vpack.c.bf16 %v725_v21, %v725_v21 }
 0x400   : > { %v728_v22 = vpop.permute.xlu0 %727 }
 0x401   : > { %v733_v23 = vsel %vm547_vm2, %v728_v22, 0 }
 0x402   : > { %742 = vmatpush.bf16.msra.mxu0 %v733_v23 }
 0x405   : > { %984 = vmatmul.msk.bf16.vlgmr.msra.gmra.mxu0 %vm507_vm1, %v726_v24 }
 0x466   : > { %v620_v25 = vpop.f32.mrf.mxu0 }
 0x467   : > { %625 = vrot.lane.b32.xlu1 %v620_v25, %s1391_s14 }
 0x46d   : > { %v682_v26 = vpop.f32.mrf.mxu2 }
 0x46e   : > { %v622_v27 = vpop.f32.mrf.mxu0 }
 0x46f   : > { %687 = vrot.lane.b32.xlu1 %v682_v26, %s1392_s20 }
 0x475   : > { %v684_v28 = vpop.f32.mrf.mxu2 }
 0x482   : > { %v744_v29 = vpop.f32.mrf.mxu0 }
 0x483   : > { %749 = vrot.lane.b32.xlu2 %v744_v29, %s1393_s16 }
 0x48a   : > { %v746_v30 = vpop.f32.mrf.mxu0 }
 0x4d9   : > { %v626_v33 = vpop.permute.xlu1 %625 }
 0x4da   : > { %629 = vst.msk [vmem:[#allocation2] sm:$0xff] %vm628_vm3, %v626_v33 }
 0x4dd   : > { %v750_v35 = vpop.permute.xlu2 %749 }
 0x4e1   : > { %v688_v34 = vpop.permute.xlu1 %687 }
 0x4e2   : > { %691 = vst.msk [vmem:[#allocation2] sm:$0xff] %vm690_vm4, %v688_v34 }
 0x4e3   : > { %753 = vst.msk [vmem:[#allocation2] sm:$0xff] %vm752_vm5, %v750_v35 }
 0x4ea   : > { %v754_v36 = vld [vmem:[#allocation2] sm:$0xff] }
 0x4eb   : > { %v755_v37 = vpack.c.bf16 %v754_v36, %v754_v36 }
 0x4ed   : > { %993 = vmatmul.msk.bf16.vlgmr.msra.gmra.mxu1 %vm451_vm0, %v755_v37 }
 0x56a   : > { %v788_v39 = vpop.f32.mrf.mxu1 }
 0x56b   : > { %v789_v40 = vadd.f32 %v1116_v38, %v788_v39 }
 0x56d   : > { %792 = vst.msk [vmem:[%s427_s9] sm:$0xff] %vm451_vm0, %v789_v40 }
 0x56e   : > { %1310 = shalt.err (!%p1307_p13)
}
 0x56f   : > { %1020 = dma.vmem_to_hbm [thread:$0]  (%p1526_p4), %s808_s11, 128, %s810_s15, %s794_s30  }
 0x572   : > { %v790_v41 = vpop.f32.mrf.mxu1 }
 0x573 PF: > { %s1691_s21 = sld [smem:[#allocation18_spill]]  ;;  %p1040_p0 = pnand %p947_p6, %p1534_p7 }
 0x575   : > { %p1041_p2 = pneg %p1040_p0 }
 0x579   : > { %s821_s20 = sand.u32 1, %s1691_s21  }
 0x57a   : > { %s822_s16 = scalar_lea.sflag [#allocation5], %s821_s20 }
 0x57b   : > { %1352 = dma.done.wait (%p1041_p2), %s822_s16, 128  }
 0x57c   : > { %1354 = vsyncadd (%p1041_p2), %s822_s16, 4294967168  ;;  %s28_s10 = sadd.s32 1, %s1377_s10   ;;  %s1693_s6 = sld [smem:[#allocation19_spill]] }
 0x57d   : > { %p25_p5 = scmp.ge.s32.totalorder %s28_s10, 4   ;;  %s1694_s29 = sld [smem:[#allocation22_spill]] }
 0x57e   : > { %s1695_s30 = sld [smem:[#allocation20_spill]]  ;;  %s1697_s27 = smov %s1361_s28 }
 0x57f   : > { %s1696_s9 = sld [smem:[#allocation21_spill]]  ;;  %27 = sbr.rel (!%p25_p5) target bundleno = 13 (0xd), region = 122 }
 0x582   : > { %s1698_s28 = smov %s1693_s6 }
 0x584   :  { %828 = vsyncpa [#allocation4], 1 }
 0x585   :  { %830 = vsyncpa [#allocation4 + $0x1], 1 }
 0x586   :  { %831 = vsyncpa [#allocation7], 1 }
 0x587   :  { %833 = vsyncpa [#allocation7 + $0x1], 1 }
 0x588   :  { %834 = vsyncpa [#allocation10], 1 }
 0x589   :  { %835 = vsyncpa [#allocation5], 1 }
 0x58a   :  { %837 = vsyncpa [#allocation5 + $0x1], 1 }

</bundles_post_ra>
